<compile_context>
chip_gen: v7x
topology: tpu7x:2x2x1
jax: 0.10.0
libtpu: 0.0.40
codegen_flags: <defaults>
</compile_context>

<pallas_src>
import math
import functools

import jax
import jax.numpy as jnp
from jax.experimental import pallas as pl
from jax.experimental.pallas import tpu as pltpu


def _round_up(x, m):
    return ((x + m - 1) // m) * m


def data_embedding_kernel(xc_ref, w_ref, pe_ref, o_ref):
    # xc_ref: (TL, 3C)  seq-tile rows of one batch, cols = [x_prev | x | x_next]
    # w_ref : (3C, D)   packed conv taps (constant index map -> fetched once)
    # pe_ref: (TL, D)   positional-encoding rows for this seq tile (block index is
    #                   independent of the inner batch axis -> stays resident)
    # o_ref : (TL, D)   output tile
    acc = jnp.dot(xc_ref[...], w_ref[...], preferred_element_type=jnp.float32)
    # dropout(p=0.05) is identity in eval mode
    o_ref[...] = (acc + pe_ref[...].astype(jnp.float32)).astype(o_ref.dtype)


@functools.partial(
    jax.jit, static_argnames=("tm_target", "use_bf16_streams", "vmem_budget_bytes")
)
def data_embedding(x, w_packed, pe, *, tm_target=1024, use_bf16_streams=False,
                   vmem_budget_bytes=16 * 1024 * 1024):
    """DataEmbedding forward: circular Conv1d(k=3, no bias) + positional encoding.

    x        : (B, L, C)   module-level input layout
    w_packed : (3*C, D)    packed conv weight (see make_conv_weight)
    pe       : (>=L, D)    positional-encoding rows
    returns  : (B, L, D)
    """
    B, L, C = x.shape
    K, D = w_packed.shape
    assert K == 3 * C
    pe = pe[:L]

    # --- circular taps (per-batch wrap) hoisted out of the kernel; C is small so the
    #     (B, L, 3C) materialization is negligible next to the PE/output streams.
    x_prev = jnp.roll(x, 1, axis=1)      # x[(t-1) mod L]
    x_next = jnp.roll(x, -1, axis=1)     # x[(t+1) mod L]
    x_cat = jnp.concatenate([x_prev, x, x_next], axis=-1)        # (B, L, 3C)

    # Only pad the sequence axis if L is not a multiple of 8 (sublane granularity).
    # Padded rows are independent (circularity already baked in) and are dropped.
    Lp = _round_up(L, 8)
    if Lp != L:
        x_cat = jnp.pad(x_cat, ((0, 0), (0, Lp - L), (0, 0)))
        pe = jnp.pad(pe, ((0, Lp - L), (0, 0)))

    if use_bf16_streams:
        stream_dtype = jnp.bfloat16
        out_dtype = jnp.bfloat16
    else:
        stream_dtype = x.dtype
        out_dtype = x.dtype

    x_rows = x_cat.reshape(B * Lp, K).astype(stream_dtype)       # (B*Lp, 3C)
    w_use = w_packed.astype(stream_dtype)                        # (3C, D)
    pe_use = pe.astype(stream_dtype)                             # (Lp, D)

    # --- choose the seq tile tl: multiple of 8, divides Lp exactly (no row pad, and
    #     tiles never cross a batch boundary), sized against the VMEM budget so the
    #     double-buffered streaming working set fits on every generation.
    stream_b = jnp.dtype(stream_dtype).itemsize
    out_b = jnp.dtype(out_dtype).itemsize
    row_bytes = (K + D) * stream_b + D * out_b
    tl_cap = max(8, (vmem_budget_bytes // (2 * row_bytes)) // 8 * 8)
    tl_cap = min(tl_cap, max(8, (tm_target // 8) * 8), Lp)
    tl = 8
    for cand in range(tl_cap, 7, -8):
        if Lp % cand == 0:
            tl = cand
            break

    n_l = Lp // tl
    # B innermost (fastest) axis -> PE tile (block index j only) stays resident
    # across the whole batch sweep; x/out advance by whole-batch strides of n_l.
    grid = (n_l, B)

    per_tile_bytes = 2 * tl * row_bytes + 2 * K * D * stream_b
    vmem_limit = int(min(64 * 1024 * 1024,
                         max(32 * 1024 * 1024, 2 * per_tile_bytes)))

    out = pl.pallas_call(
        data_embedding_kernel,
        out_shape=jax.ShapeDtypeStruct((B * Lp, D), out_dtype),
        grid_spec=pltpu.PrefetchScalarGridSpec(
            num_scalar_prefetch=0,
            grid=grid,
            in_specs=[
                # x rows for (seq tile j, batch b)
                pl.BlockSpec((tl, K), lambda j, b: (b * n_l + j, 0)),
                # packed weight: tiny, constant index map => fetched once
                pl.BlockSpec((K, D), lambda j, b: (0, 0)),
                # PE: independent of b => resident across the inner batch sweep
                pl.BlockSpec((tl, D), lambda j, b: (j, 0)),
            ],
            out_specs=pl.BlockSpec((tl, D), lambda j, b: (b * n_l + j, 0)),
        ),
        compiler_params=pltpu.CompilerParams(
            dimension_semantics=("parallel", "parallel"),
            vmem_limit_bytes=vmem_limit,
        ),
    )(x_rows, w_use, pe_use)

    out = out.reshape(B, Lp, D)
    if Lp != L:
        out = out[:, :L, :]
    return out


def make_positional_encoding(L, d_model, dtype=jnp.float32):
    position = jnp.arange(L, dtype=jnp.float32)[:, None]                        # (L, 1)
    div_term = jnp.exp(
        jnp.arange(0, d_model, 2, dtype=jnp.float32) * -(math.log(10000.0) / d_model)
    )                                                                            # (D/2,)
    pe = jnp.zeros((L, d_model), jnp.float32)
    pe = pe.at[:, 0::2].set(jnp.sin(position * div_term))
    pe = pe.at[:, 1::2].set(jnp.cos(position * div_term))
    return pe.astype(dtype)


def make_conv_weight(key, c_in, d_model, dtype=jnp.float32):
    # PyTorch Conv1d weight shape: (d_model, c_in, 3), kaiming_normal_
    # mode='fan_in', nonlinearity='leaky_relu' (negative_slope=0.01).
    fan_in = c_in * 3
    gain = math.sqrt(2.0 / (1.0 + 0.01 ** 2))
    std = gain / math.sqrt(fan_in)
    w = jax.random.normal(key, (d_model, c_in, 3), jnp.float32) * std
    # pack to a single (3*c_in, d_model) matrix: row (k*c_in + c) is tap k, channel c,
    # where tap k multiplies x[(t + k - 1) mod L]  (matches the [x_prev|x|x_next] LHS).
    w_packed = jnp.transpose(w, (2, 1, 0)).reshape(3 * c_in, d_model).astype(dtype)
    return w_packed


if __name__ == "__main__":
    B, L, C_IN, D_MODEL = 2, 8, 4, 32

    key = jax.random.PRNGKey(0)
    kx, kw = jax.random.split(key)

    x = jax.random.normal(kx, (B, L, C_IN), jnp.float32)
    w_packed = make_conv_weight(kw, C_IN, D_MODEL)        # (3*C_IN, D_MODEL)
    pe = make_positional_encoding(L, D_MODEL)             # (L, D_MODEL)

    out = data_embedding(x, w_packed, pe)
    out = jax.block_until_ready(out)

    # plain-JAX reference for the same semantics (independent of the kernel packing)
    w_taps = w_packed.reshape(3, C_IN, D_MODEL)
    x_prev = jnp.roll(x, 1, axis=1)
    x_next = jnp.roll(x, -1, axis=1)
    ref = (
        jnp.einsum("blc,cd->bld", x_prev, w_taps[0])
        + jnp.einsum("blc,cd->bld", x, w_taps[1])
        + jnp.einsum("blc,cd->bld", x_next, w_taps[2])
        + pe[None]
    )
    assert out.shape == (B, L, D_MODEL)
    assert jnp.allclose(out, ref, atol=1e-4, rtol=1e-4), float(jnp.max(jnp.abs(out - ref)))

    print("KERNEL_OK")
</pallas_src>

<mosaic_0001>
module attributes {stable_mosaic.version = 11 : i64} {
  func.func @data_embedding_kernel(%arg0: i32, %arg1: i32, %arg2: memref<8x12xf32, #tpu.memory_space<vmem>>, %arg3: memref<12x32xf32, #tpu.memory_space<vmem>>, %arg4: memref<8x32xf32, #tpu.memory_space<vmem>>, %arg5: memref<8x32xf32, #tpu.memory_space<vmem>>) attributes {dimension_semantics = [#tpu.dimension_semantics<parallel>, #tpu.dimension_semantics<parallel>], iteration_bounds = array<i64: 1, 2>, scalar_prefetch = 0 : i64, scratch_operands = 0 : i64, tpu.core_type = #tpu.core_type<tc>, window_params = [{transform_indices = @transform_0, window_bounds = array<i64: 8, 12>}, {pipeline_mode = #tpu.pipeline_mode<synchronous>, transform_indices = @transform_1, window_bounds = array<i64: 12, 32>}, {transform_indices = @transform_2, window_bounds = array<i64: 8, 32>}, {transform_indices = @transform_3, window_bounds = array<i64: 8, 32>}]} {
    %c0 = arith.constant 0 : index
    %c0_0 = arith.constant 0 : index
    %0 = vector.load %arg2[%c0, %c0_0] : memref<8x12xf32, #tpu.memory_space<vmem>>, vector<8x12xf32>
    %c0_1 = arith.constant 0 : index
    %c0_2 = arith.constant 0 : index
    %1 = vector.load %arg3[%c0_1, %c0_2] : memref<12x32xf32, #tpu.memory_space<vmem>>, vector<12x32xf32>
    %cst = arith.constant dense<0.000000e+00> : vector<8x32xf32>
    %2 = tpu.matmul %0, %1, %cst {dimension_numbers = #tpu.dot_dimension_numbers<[1], [0], [0], [1], [0, 0, 1, 1], [], []>} : vector<8x12xf32>, vector<12x32xf32>, vector<8x32xf32> -> vector<8x32xf32>
    %c0_3 = arith.constant 0 : index
    %c0_4 = arith.constant 0 : index
    %3 = vector.load %arg4[%c0_3, %c0_4] : memref<8x32xf32, #tpu.memory_space<vmem>>, vector<8x32xf32>
    %4 = arith.addf %2, %3 : vector<8x32xf32>
    %c0_5 = arith.constant 0 : index
    %c0_6 = arith.constant 0 : index
    %5 = vector.load %arg5[%c0_5, %c0_6] : memref<8x32xf32, #tpu.memory_space<vmem>>, vector<8x32xf32>
    tpu.vector_store %arg5[%c0_5, %c0_6], %4 {strides = array<i32>} : memref<8x32xf32, #tpu.memory_space<vmem>>, vector<8x32xf32>,
    return
  }
  func.func @transform_0(%arg0: i32, %arg1: i32) -> (i32, i32) {
    %c1_i32 = arith.constant 1 : i32
    %0 = arith.muli %arg1, %c1_i32 : i32
    %1 = arith.addi %0, %arg0 : i32
    %c0_i32 = arith.constant 0 : i32
    %c0_i32_0 = arith.constant 0 : i32
    return %1, %c0_i32 : i32, i32
  }
  func.func @transform_1(%arg0: i32, %arg1: i32) -> (i32, i32) {
    %c0_i32 = arith.constant 0 : i32
    %c0_i32_0 = arith.constant 0 : i32
    %c0_i32_1 = arith.constant 0 : i32
    return %c0_i32, %c0_i32_0 : i32, i32
  }
  func.func @transform_2(%arg0: i32, %arg1: i32) -> (i32, i32) {
    %c0_i32 = arith.constant 0 : i32
    %c0_i32_0 = arith.constant 0 : i32
    return %arg0, %c0_i32 : i32, i32
  }
  func.func @transform_3(%arg0: i32, %arg1: i32) -> (i32, i32) {
    %c1_i32 = arith.constant 1 : i32
    %0 = arith.muli %arg1, %c1_i32 : i32
    %1 = arith.addi %0, %arg0 : i32
    %c0_i32 = arith.constant 0 : i32
    %c0_i32_0 = arith.constant 0 : i32
    return %1, %c0_i32 : i32, i32
  }
}

</mosaic_0001>

<bundles_post_ra>
// kernel: data_embedding.1
= control target key start
LH: loop header
LB: loop body
LE: loop exit
PB: predicated region body
PF: predicated region fallthrough
CT: control target
= control target key end

     0   :  { %8 = vsyncpa [#allocation3], 0  ;;  %s700_s0 = inlined_call_operand.vmem [shape: f32[16,12], index: 0, kind: input, shape index: {}]   ;;  %s701_s1 = inlined_call_operand.vmem [shape: f32[12,32], index: 1, kind: input, shape index: {}]   ;;  %s702_s2 = inlined_call_operand.vmem [shape: f32[8,32], index: 2, kind: input, shape index: {}]   ;;  %s703_s3 = inlined_call_operand.hbm [shape: f32[16,32], index: 3, kind: output, shape index: {}]  }
   0x1   :  { %10 = vsyncpa [#allocation3 + $0x1], 0  ;;  %s579_s12 = smov 0   ;;  %s581_s13 = smov 0  }
   0x2   :  { %s583_s14 = smov 0   ;;  %s585_s15 = smov 0  }
   0x3   :  { %s587_s16 = smov 0   ;;  %s589_s17 = smov 0  }
   0x4 LB: > { %s387_s18 = sadd.s32 4294967295, %s552_s17   ;;  %s388_s19 = sadd.s32 4294967294, %s552_s17   ;;  %s552_s17 = sphi %s589_s17, %s16_s17   ;;  %s548_s16 = sphi %s587_s16, %s710_s16   ;;  %s544_s15 = sphi %s585_s15, %s709_s15   ;;  %s540_s14 = sphi %s583_s14, %s708_s14   ;;  %s536_s13 = sphi %s581_s13, %s707_s13   ;;  %s532_s12 = sphi %s579_s12, %s706_s12  }
   0x5   : > { %s25_s20 = sadd.s32 1, %s548_s16  ;;  %s112_s21 = sadd.s32 1, %s540_s14 }
   0x6   : > { %p26_p0 = scmp.ge.s32.totalorder %s25_s20, 2  ;;  %p122_p1 = scmp.ne.s32.totalorder %s540_s14, %s536_s13 }
   0x7   : > { %p123_p2 = scmp.eq.s32.totalorder %s387_s18, 1  ;;  %p128_p3 = scmp.ne.s32.totalorder %s536_s13, %s532_s12 }
   0x8   : > { %s712_s20 = smov (%p26_p0, %s25_s20), 0  ;;  %p129_p5 = scmp.eq.s32.totalorder %s388_s19, 1 }
   0x9   : > { %p619_p4 = por %p123_p2, %p122_p1  ;;  %s109_s23 = ssub.s32 %s548_s16, %s712_s20 }
   0xa   : > { %p392_p6 = scmp.ge.s32.totalorder %s552_s17, 1  ;;  %p110_p7 = scmp.eq.s32.totalorder %s109_s23, 0 }
   0xb   : > { %p626_p8 = por %p129_p5, %p128_p3  ;;  %p166_p9 = scmp.lt.s32.totalorder %s552_s17, 3 }
   0xc   : > { %s632_s25 = scalar_select %p110_p7, %s540_s14, %s112_s21  }
   0xd   : > { %p167_p10 = pnand %p392_p6, %p166_p9 }
   0xe   : > { %v206_v0 = vld [vmem:[%s701_s1] sm:$0xff] (!%p167_p10)  ;;  %v207_v1 = vld [vmem:[%s701_s1 + $0x8] sm:$0xf] (!%p167_p10)  ;;  %vm213_vm0 = vcmask (!%p167_p10), 1043456   ;;  %v554_v2 = vmov (!%p167_p10), 0.0|0.0   ;;  %vm555_vm1 = vmmov (!%p167_p10), 1  }
   0xf   : > { %170 = sbr.rel (%p167_p10) target bundleno = 255 (0xff), region = 32  ;;  %411 = vmatprep.subr.bf16.mxu0 (!%p167_p10), %v554_v2  ;;  %v412_v3 = vpack.c.bf16 (!%p167_p10), %v207_v1, %v206_v0  ;;  %vm413_vm2 = vmpackc.low (!%p167_p10), %vm213_vm0, %vm555_vm1  ;;  %p195_p11 = scmp.lt.s32.totalorder (!%p167_p10), %s544_s15, 1  ;;  %vm556_vm3 = vmmov (!%p167_p10), 0   ;;  %v557_v4 = vmov (!%p167_p10), 0.0   ;;  %vm209_vm4 = vcmask (!%p167_p10), 97280   ;;  %v208_v6 = vld [vmem:[%s702_s2] sm:$0xff] (!%p167_p10) }
  0x10   : > { %408 = vmatprep.mubr.msk.f32.mxu0 (!%p167_p10), %vm556_vm3, %v557_v4  ;;  %s191_s8 = sand.u32 (!%p167_p10), 1, %s536_s13   ;;  %s398_s18 = sshll.u32 (!%p167_p10), %s544_s15, 7  ;;  %vm287_vm5 = vcmask (!%p167_p10), 261120  }
  0x11   : > { %414 = vmatpush3.bf16.msk.msra.mxu0 (!%p167_p10), %vm413_vm2, %v412_v3  ;;  %s393_s9 = sshll.u32 (!%p167_p10), %s191_s8, 3  ;;  %s653_s27 = scalar_lea.hbm (!%p167_p10), %s703_s3, %s398_s18 }
  0x12   : > { %s193_s19 = scalar_lea.vmem (!%p167_p10), [#allocation2], %s393_s9  ;;  %s290_s28 = scalar_lea.sflag (!%p167_p10), [#allocation3], %s191_s8 }
  0x13   : > { %s304_s21 = sshll.u32 (!%p167_p10), %s193_s19, 4  ;;  %s655_s21 = int_to_ptr.vmem [resolvable:$true] %s304_s21 }
  0x14   : > { %s474_s29 = scalar_lea.vmem (!%p167_p10), %s655_s21, 128 }
  0x15   : > { %p475_p12 = scmp.ne.s32.totalorder (!%p167_p10), %s655_s21, %s474_s29 }
  0x16   : > { %s196_s30 = scalar_select %p195_p11, %s544_s15, 1 }
  0x17   : > { %p476_p13 = pnand %p475_p12, %p619_p4  ;;  %s558_s15 = smov [#allocation2]  }
  0x18   : > { %s394_s4 = sshll.u32 %s196_s30, 3  ;;  %s478_s30 = sshll.u32 %s558_s15, 4  ;;  %s479_s30 = int_to_ptr.vmem [resolvable:$false] %s478_s30 }
  0x19   : > { %s198_s7 = scalar_lea.vmem %s700_s0, %s394_s4  ;;  %p477_p0 = pneg %p476_p13 }
  0x1a   : > { %v205_v5 = vld [vmem:[%s198_s7] sm:$0xff]  ;;  %s480_s4 = scalar_lea.vmem %s479_s30, 256  ;;  %p481_p1 = scmp.lt.s32.totalorder %s655_s21, %s479_s30 }
  0x1b   : > { %409 = vmatmul.mubr.msk.f32.vlgmr.msra.gmra.mrb[0].mxu0 %vm209_vm4, %v205_v5  ;;  %p482_p2 = scmp.lt.s32.totalorder %s480_s4, %s474_s29 }
  0x1d   : > { %p483_p3 = por %p482_p2, %p481_p1 }
  0x1f   : > { %p484_p5 = pnand %p483_p3, %p477_p0 }
  0xee   : > { %v283_v7 = vpop.f32.mrb[0].mxu0 }
  0xef   : > { %v284_v8 = vadd.f32 %v283_v7, %v208_v6  ;;  %v410_v9 = vpop.f32.mrb[1].mxu0 }
  0xf1   : > { %288 = vst.msk [vmem:[%s193_s19] sm:$0xff] %vm287_vm5, %v284_v8 }
  0xf2   : > { %487 = shalt.err (!%p484_p5)
}
  0xf3   : > { %s488_s5 = scalar_lea.hbm %s653_s27, 128  ;;  %s492_s8 = scalar_lea.hbm %s703_s3, 256 }
  0xf4   : > { %p489_p6 = scmp.ne.s32.totalorder %s653_s27, %s488_s5  ;;  %p493_p10 = scmp.lt.u32.totalorder %s653_s27, %s703_s3 }
  0xf5   : > { %p494_p11 = scmp.lt.u32.totalorder %s492_s8, %s488_s5  ;;  %p496_p13 = scmp.lt.u32.totalorder %s488_s5, %s653_s27 }
  0xf6   : > { %p490_p7 = pnand %p489_p6, %p619_p4 }
  0xf7   : > { %p495_p12 = por %p494_p11, %p493_p10 }
  0xf8   : > { %p491_p9 = pneg %p490_p7 }
  0xf9   : > { %p497_p0 = por %p496_p13, %p495_p12 }
  0xfb   : > { %p498_p1 = pnand %p497_p0, %p491_p9 }
  0xfd   : > { %501 = shalt.err (!%p498_p1)
}
  0xfe   : > { %415 = dma.vmem_to_hbm [thread:$0]  (%p619_p4), %s655_s21, 128, %s653_s27, %s290_s28  }
  0xff PF: > { %p421_p2 = scmp.ge.s32.totalorder %s552_s17, 2  ;;  %s316_s11 = sand.u32 1, %s532_s12  }
 0x100   : > { %s317_s18 = scalar_lea.sflag [#allocation3], %s316_s11 }
 0x101   : > { %p418_p3 = pnand %p421_p2, %p626_p8 }
 0x103   : > { %527 = dma.done.wait (!%p418_p3), %s317_s18, 128  }
 0x104   : > { %529 = vsyncadd (!%p418_p3), %s317_s18, 4294967168  ;;  %s16_s17 = sadd.s32 1, %s552_s17   ;;  %s706_s12 = smov %s536_s13 }
 0x105   : > { %p13_p5 = scmp.ge.s32.totalorder %s16_s17, 4   ;;  %s707_s13 = smov %s540_s14 }
 0x106   : > { %s708_s14 = smov %s632_s25  ;;  %s709_s15 = smov %s548_s16 }
 0x107   : > { %s710_s16 = smov %s712_s20  ;;  %15 = sbr.rel (!%p13_p5) target bundleno = 4 (0x4), region = 70 }
 0x10e   :  { %322 = vsyncpa [#allocation3], 1 }
 0x10f   :  { %324 = vsyncpa [#allocation3 + $0x1], 1 }

</bundles_post_ra>
